<compile_context>
chip_gen: v6e
topology: v6e:2x2x1
jax: 0.10.0
libtpu: 0.0.40
codegen_flags: <defaults>
</compile_context>

<pallas_src>
import functools

import numpy as np
import jax
import jax.numpy as jnp
from jax.experimental import pallas as pl
from jax.experimental.pallas import tpu as pltpu


def _round_up(x, m):
    return (x + m - 1) // m * m


def _fused_ln_pool_kernel(sl_ref, emb_ref, gamma_ref, beta_ref, o_ref, *,
                          hidden, eps):
    # sl_ref:     (Bb, Wp, 2) int32  per-word [start, length] of its sub-token slice
    # emb_ref:    (Bb, Tp, Hp) f32   summed token+position+type embeddings
    # gamma_ref:  (1, Hp) f32        LN scale (zero in padded lanes, if any)
    # beta_ref:   (1, Hp) f32        LN shift (zero in padded lanes, if any)
    # o_ref:      (Bb, Wp, Hp) f32   per-word mean-pooled LN hidden states
    x = emb_ref[...]                                         # (Bb, Tp, Hp) f32

    # --- LayerNorm statistics over the real hidden dim, one traversal -------
    # Padded hidden columns of x (if any) are zero, so sums over Hp equal sums
    # over the real H; divide by the real H.  Affine is deferred (see below).
    s1 = jnp.sum(x, axis=-1, keepdims=True)
    s2 = jnp.sum(x * x, axis=-1, keepdims=True)
    mu = s1 * (1.0 / hidden)
    var = jnp.maximum(s2 * (1.0 / hidden) - mu * mu, 0.0)    # clamp f32 cancellation
    inv = jax.lax.rsqrt(var + eps)
    y_c = (x - mu) * inv                                     # f32, no gamma/beta yet

    # --- per-word 0/1 pooling mask built in-kernel (cheap VPU filler) --------
    Bb, Wp, _ = o_ref.shape
    Tp = x.shape[1]
    t_idx = jax.lax.broadcasted_iota(jnp.int32, (Bb, Wp, Tp), 2)
    s = sl_ref[:, :, 0:1]                                    # (Bb, Wp, 1) int32
    l = sl_ref[:, :, 1:2]                                    # (Bb, Wp, 1) int32
    in_word = (t_idx >= s) & (t_idx < s + l)
    mask = in_word.astype(jnp.bfloat16)                      # 0/1 exact in bf16

    # --- pooling: batched (Wp,Tp)@(Tp,Hp), bf16 operands / f32 accumulate ----
    # (MXU M = Wp is tiny here; if this ever becomes compute-bound, fold (b,w)
    #  into one M axis — secondary, kernel is HBM-bound at these intensities.)
    pooled = jnp.einsum("bwt,bth->bwh",
                        mask, y_c.astype(jnp.bfloat16),
                        preferred_element_type=jnp.float32)  # (Bb, Wp, Hp) f32

    # --- deferred 1/len + LN affine on the small (Wp, Hp) result -------------
    valid = (l > 0).astype(jnp.float32)                      # padded words -> 0 rows
    inv_len = valid / jnp.maximum(l, 1).astype(jnp.float32)
    o_ref[...] = (pooled * inv_len) * gamma_ref[...] + beta_ref[...] * valid


def bert_embed_word_pool(emb_sum, gamma, beta, starts, lens, *,
                         eps=1e-12, batch_block=None,
                         vmem_budget_bytes=24 << 20):
    """Fused BERT-embedding LayerNorm + per-word mean pooling.

    emb_sum: [B, T, H] f32  word+position+token-type embedding sum
    gamma, beta: [H] f32    LayerNorm affine parameters
    starts, lens: [B, W] i32 sub-token slice of every word (CLS/SEP excluded)
    returns: [B, W, H] f32  mean of LN hidden states over each word's slice

    vmem_budget_bytes sizes the per-step blocks: default 24 MiB is safe for
    v7x (64 MiB physical / 32 MiB scoped); on v5e/v6e (128 MiB) it can be
    raised to allow a larger batch block.
    """
    B, T, H = emb_sum.shape
    W = starts.shape[1]

    Hp = _round_up(H, 128)          # lane-dense last dim
    Tp = _round_up(T, 8)            # sublane-dense contraction dim
    Wp = _round_up(W, 8)            # sublane-dense output rows

    # Fast path: aligned shapes (normal BERT, e.g. T=512, H=768) need no pad
    # copy — emb_sum goes straight to pallas_call.  The fallback pad is an
    # extra HBM pass; prefer producing emb_sum already aligned upstream.
    if (Tp, Hp) != (T, H):
        emb_p = jnp.zeros((B, Tp, Hp), jnp.float32).at[:, :T, :H].set(
            emb_sum.astype(jnp.float32))
    else:
        emb_p = emb_sum.astype(jnp.float32)

    if Hp != H:
        gamma_p = jnp.zeros((1, Hp), jnp.float32).at[0, :H].set(gamma)
        beta_p = jnp.zeros((1, Hp), jnp.float32).at[0, :H].set(beta)
    else:
        gamma_p = gamma.astype(jnp.float32).reshape(1, Hp)
        beta_p = beta.astype(jnp.float32).reshape(1, Hp)

    # starts/lens merged into one tiny (B, Wp, 2) int32 input -> one DMA/step.
    sl = jnp.stack([starts.astype(jnp.int32), lens.astype(jnp.int32)], axis=-1)
    if Wp != W:
        sl = jnp.zeros((B, Wp, 2), jnp.int32).at[:, :W, :].set(sl)

    # --- batch block: fill the VMEM budget, keep grid extent >= 2 (v7x TCs) --
    if batch_block is None:
        # per-step live bytes ~= 2x double-buffered emb block + ~4 emb-sized
        # in-kernel temps (x, y_c, bf16 y, mask/iota) + double-buffered output.
        per_b = (Tp * Hp * 4) * 6 + (Wp * Hp * 4) * 2 + (Wp * Tp * 4) * 2
        bb = max(1, int(vmem_budget_bytes) // max(per_b, 1))
        bb = min(bb, max(B // 2, 1))
        while B % bb:
            bb -= 1
    else:
        bb = max(1, min(batch_block, B))
    assert B % bb == 0, "batch block must divide the batch size"

    kernel = functools.partial(_fused_ln_pool_kernel, hidden=H, eps=eps)

    out_p = pl.pallas_call(
        kernel,
        out_shape=jax.ShapeDtypeStruct((B, Wp, Hp), jnp.float32),
        grid=(B // bb,),
        in_specs=[
            pl.BlockSpec((bb, Wp, 2), lambda b: (b, 0, 0)),      # [start,len]
            pl.BlockSpec((bb, Tp, Hp), lambda b: (b, 0, 0)),     # emb sum
            pl.BlockSpec((1, Hp), lambda b: (0, 0)),             # gamma
            pl.BlockSpec((1, Hp), lambda b: (0, 0)),             # beta
        ],
        out_specs=pl.BlockSpec((bb, Wp, Hp), lambda b: (b, 0, 0)),
        compiler_params=pltpu.CompilerParams(
            dimension_semantics=("parallel",),
            vmem_limit_bytes=max(int(vmem_budget_bytes), 32 << 20)),
    )(sl, emb_p, gamma_p, beta_p)

    if (Wp, Hp) != (W, H):
        return out_p[:, :W, :H]      # only taken for misaligned W/H
    return out_p


# --------------------------------- driver ----------------------------------

if __name__ == "__main__":
    # Small shapes; H a multiple of 128 and T padded to a multiple of 8 in the
    # producer so the kernel input needs no extra padding pass.
    B, W, H, V = 2, 8, 128, 64      # batch, words/seq, hidden, vocab

    key = jax.random.PRNGKey(0)
    k_w, k_p, k_t, k_ids, k_g, k_b = jax.random.split(key, 6)

    # Synthetic deterministic "tokenization": word j of sequence i splits into
    # 1 + ((i + j) % 3) WordPiece tokens; sequence = [CLS] + pieces + [SEP].
    # TODO(synk): real WordPiece tokenization of strings is host-side string
    # processing with no Pallas equivalent; replaced by this deterministic stand-in.
    counts = [[1 + ((i + j) % 3) for j in range(W)] for i in range(B)]
    seq_lens = [1 + sum(c) + 1 for c in counts]
    T = _round_up(max(seq_lens), 8)       # pad T in the producer (PAD token id 0)
    MAX_POS = T

    # Deterministic "BertModel" embedding-layer parameters.
    word_emb = jax.random.normal(k_w, (V, H), jnp.float32) * 0.02
    pos_emb = jax.random.normal(k_p, (MAX_POS, H), jnp.float32) * 0.02
    type_emb = jax.random.normal(k_t, (2, H), jnp.float32) * 0.02
    ln_gamma = 1.0 + 0.1 * jax.random.normal(k_g, (H,), jnp.float32)
    ln_beta = 0.1 * jax.random.normal(k_b, (H,), jnp.float32)

    rand_ids = np.asarray(jax.random.randint(k_ids, (B, T), 3, V), dtype=np.int32)
    token_ids = np.zeros((B, T), dtype=np.int32)           # 0 = [PAD]
    starts = np.zeros((B, W), dtype=np.int32)
    lens_w = np.zeros((B, W), dtype=np.int32)
    for i in range(B):
        pos = 0
        token_ids[i, pos] = 1                              # [CLS]
        pos += 1
        for j in range(W):
            starts[i, j] = pos
            lens_w[i, j] = counts[i][j]
            for _ in range(counts[i][j]):
                token_ids[i, pos] = rand_ids[i, pos]
                pos += 1
        token_ids[i, pos] = 2                              # [SEP]

    tok = jnp.asarray(token_ids)
    starts_j = jnp.asarray(starts)
    lens_j = jnp.asarray(lens_w)

    # BERT embedding layer input: word + position + token-type embeddings.
    emb_sum = (word_emb[tok]
               + pos_emb[jnp.arange(T)][None, :, :]
               + type_emb[0][None, None, :])

    # TODO(synk): the pretrained BertModel's multi-layer transformer encoder
    # (and its attention_mask) is not reproduced; only the embedding layer plus
    # the per-word mean pooling of forward() are implemented.
    out = bert_embed_word_pool(emb_sum, ln_gamma, ln_beta, starts_j, lens_j)
    out = jax.block_until_ready(out)

    # Pure-JAX f32 reference for the same computation.
    mu = jnp.mean(emb_sum, axis=-1, keepdims=True)
    var = jnp.mean((emb_sum - mu) ** 2, axis=-1, keepdims=True)
    ref_ln = (emb_sum - mu) * jax.lax.rsqrt(var + 1e-12) * ln_gamma + ln_beta
    t_idx = jnp.arange(T)[None, None, :]
    s = starts_j[:, :, None]
    e = s + lens_j[:, :, None]
    P = jnp.where((t_idx >= s) & (t_idx < e),
                  1.0 / lens_j[:, :, None].astype(jnp.float32), 0.0)
    ref = jnp.einsum("bwt,bth->bwh", P, ref_ln)

    assert out.shape == (B, W, H)
    # Only bf16 rounding is the activation cast feeding the MXU (the 0/1 mask
    # is exact, 1/len and the LN affine are applied in f32 post-matmul), so the
    # tolerance is tightened vs. the previous version.
    np.testing.assert_allclose(np.asarray(out), np.asarray(ref),
                               rtol=2e-2, atol=2e-2)
    print("KERNEL_OK")
</pallas_src>

<mosaic_0001>
module attributes {stable_mosaic.version = 11 : i64} {
  func.func @_fused_ln_pool_kernel(%arg0: i32, %arg1: memref<1x8x2xi32, #tpu.memory_space<vmem>>, %arg2: memref<1x24x128xf32, #tpu.memory_space<vmem>>, %arg3: memref<1x128xf32, #tpu.memory_space<vmem>>, %arg4: memref<1x128xf32, #tpu.memory_space<vmem>>, %arg5: memref<1x8x128xf32, #tpu.memory_space<vmem>>) attributes {dimension_semantics = [#tpu.dimension_semantics<parallel>], iteration_bounds = array<i64: 2>, scalar_prefetch = 0 : i64, scratch_operands = 0 : i64, tpu.core_type = #tpu.core_type<tc>, window_params = [{transform_indices = @transform_0, window_bounds = array<i64: 1, 8, 2>}, {transform_indices = @transform_1, window_bounds = array<i64: 1, 24, 128>}, {pipeline_mode = #tpu.pipeline_mode<synchronous>, transform_indices = @transform_2, window_bounds = array<i64: 1, 128>}, {pipeline_mode = #tpu.pipeline_mode<synchronous>, transform_indices = @transform_3, window_bounds = array<i64: 1, 128>}, {transform_indices = @transform_4, window_bounds = array<i64: 1, 8, 128>}]} {
    %c0 = arith.constant 0 : index
    %c0_0 = arith.constant 0 : index
    %c0_1 = arith.constant 0 : index
    %0 = vector.load %arg2[%c0, %c0_0, %c0_1] : memref<1x24x128xf32, #tpu.memory_space<vmem>>, vector<1x24x128xf32>
    %cst = arith.constant dense<0.000000e+00> : vector<1x24xf32>
    %1 = vector.multi_reduction <add>, %0, %cst [2] : vector<1x24x128xf32> to vector<1x24xf32>
    %2 = vector.shape_cast %1 : vector<1x24xf32> to vector<1x24x1xf32>
    %3 = arith.mulf %0, %0 : vector<1x24x128xf32>
    %cst_2 = arith.constant dense<0.000000e+00> : vector<1x24xf32>
    %4 = vector.multi_reduction <add>, %3, %cst_2 [2] : vector<1x24x128xf32> to vector<1x24xf32>
    %5 = vector.shape_cast %4 : vector<1x24xf32> to vector<1x24x1xf32>
    %cst_3 = arith.constant 7.812500e-03 : f32
    %6 = vector.broadcast %cst_3 : f32 to vector<1x24x1xf32>
    %7 = arith.mulf %2, %6 : vector<1x24x1xf32>
    %cst_4 = arith.constant 7.812500e-03 : f32
    %8 = vector.broadcast %cst_4 : f32 to vector<1x24x1xf32>
    %9 = arith.mulf %5, %8 : vector<1x24x1xf32>
    %10 = arith.mulf %7, %7 : vector<1x24x1xf32>
    %11 = arith.subf %9, %10 : vector<1x24x1xf32>
    %cst_5 = arith.constant 0.000000e+00 : f32
    %12 = vector.broadcast %cst_5 : f32 to vector<1x24x1xf32>
    %13 = arith.maximumf %11, %12 : vector<1x24x1xf32>
    %cst_6 = arith.constant 9.99999996E-13 : f32
    %14 = vector.broadcast %cst_6 : f32 to vector<1x24x1xf32>
    %15 = arith.addf %13, %14 : vector<1x24x1xf32>
    %16 = math.rsqrt %15 : vector<1x24x1xf32>
    %17 = vector.broadcast %7 : vector<1x24x1xf32> to vector<1x24x128xf32>
    %18 = arith.subf %0, %17 : vector<1x24x128xf32>
    %19 = vector.broadcast %16 : vector<1x24x1xf32> to vector<1x24x128xf32>
    %20 = arith.mulf %18, %19 : vector<1x24x128xf32>
    %21 = tpu.iota {dimensions = array<i32: 2>} : vector<1x8x24xi32>
    %c0_7 = arith.constant 0 : index
    %c0_8 = arith.constant 0 : index
    %c0_9 = arith.constant 0 : index
    %22 = vector.load %arg1[%c0_7, %c0_8, %c0_9] : memref<1x8x2xi32, #tpu.memory_space<vmem>>, vector<1x8x1xi32>
    %c0_10 = arith.constant 0 : index
    %c0_11 = arith.constant 0 : index
    %c1 = arith.constant 1 : index
    %23 = vector.load %arg1[%c0_10, %c0_11, %c1] : memref<1x8x2xi32, #tpu.memory_space<vmem>>, vector<1x8x1xi32>
    %24 = vector.broadcast %22 : vector<1x8x1xi32> to vector<1x8x24xi32>
    %25 = arith.cmpi sge, %21, %24 : vector<1x8x24xi32>
    %26 = arith.addi %22, %23 : vector<1x8x1xi32>
    %27 = vector.broadcast %26 : vector<1x8x1xi32> to vector<1x8x24xi32>
    %28 = arith.cmpi slt, %21, %27 : vector<1x8x24xi32>
    %29 = arith.andi %25, %28 : vector<1x8x24xi1>
    %30 = arith.extui %29 : vector<1x8x24xi1> to vector<1x8x24xi32>
    %31 = arith.sitofp %30 : vector<1x8x24xi32> to vector<1x8x24xf32>
    %32 = arith.truncf %31 : vector<1x8x24xf32> to vector<1x8x24xbf16>
    %33 = arith.truncf %20 : vector<1x24x128xf32> to vector<1x24x128xbf16>
    "tpu.trace_start"() <{level = 10 : i32, message = "bwt,bth->bwh"}> : () -> ()
    %cst_12 = arith.constant dense<0.000000e+00> : vector<1x8x128xf32>
    %34 = tpu.matmul %32, %33, %cst_12 {dimension_numbers = #tpu.dot_dimension_numbers<[2], [1], [1], [2], [0, 0, 0, 1, 1, 2], [0], [0]>} : vector<1x8x24xbf16>, vector<1x24x128xbf16>, vector<1x8x128xf32> -> vector<1x8x128xf32>
    %c0_i32 = arith.constant 0 : i32
    "tpu.trace_stop"() : () -> ()
    %35 = vector.broadcast %c0_i32 : i32 to vector<1x8x1xi32>
    %36 = arith.cmpi sgt, %23, %35 : vector<1x8x1xi32>
    %37 = arith.extui %36 : vector<1x8x1xi1> to vector<1x8x1xi32>
    %38 = arith.sitofp %37 : vector<1x8x1xi32> to vector<1x8x1xf32>
    %c1_i32 = arith.constant 1 : i32
    %39 = vector.broadcast %c1_i32 : i32 to vector<1x8x1xi32>
    %40 = arith.maxsi %23, %39 : vector<1x8x1xi32>
    %41 = arith.sitofp %40 : vector<1x8x1xi32> to vector<1x8x1xf32>
    %42 = arith.divf %38, %41 : vector<1x8x1xf32>
    %43 = vector.broadcast %42 : vector<1x8x1xf32> to vector<1x8x128xf32>
    %44 = arith.mulf %34, %43 : vector<1x8x128xf32>
    %c0_13 = arith.constant 0 : index
    %c0_14 = arith.constant 0 : index
    %45 = vector.load %arg3[%c0_13, %c0_14] : memref<1x128xf32, #tpu.memory_space<vmem>>, vector<1x128xf32>
    %46 = vector.shape_cast %45 : vector<1x128xf32> to vector<1x1x128xf32>
    %47 = vector.broadcast %46 : vector<1x1x128xf32> to vector<1x8x128xf32>
    %48 = arith.mulf %44, %47 : vector<1x8x128xf32>
    %c0_15 = arith.constant 0 : index
    %c0_16 = arith.constant 0 : index
    %49 = vector.load %arg4[%c0_15, %c0_16] : memref<1x128xf32, #tpu.memory_space<vmem>>, vector<1x128xf32>
    %50 = vector.shape_cast %49 : vector<1x128xf32> to vector<1x1x128xf32>
    %51 = vector.broadcast %50 : vector<1x1x128xf32> to vector<1x8x128xf32>
    %52 = vector.broadcast %38 : vector<1x8x1xf32> to vector<1x8x128xf32>
    %53 = arith.mulf %51, %52 : vector<1x8x128xf32>
    %54 = arith.addf %48, %53 : vector<1x8x128xf32>
    %c0_17 = arith.constant 0 : index
    %c0_18 = arith.constant 0 : index
    %c0_19 = arith.constant 0 : index
    %55 = vector.load %arg5[%c0_17, %c0_18, %c0_19] : memref<1x8x128xf32, #tpu.memory_space<vmem>>, vector<1x8x128xf32>
    tpu.vector_store %arg5[%c0_17, %c0_18, %c0_19], %54 {strides = array<i32>} : memref<1x8x128xf32, #tpu.memory_space<vmem>>, vector<1x8x128xf32>,
    return
  }
  func.func @transform_0(%arg0: i32) -> (i32, i32, i32) {
    %c0_i32 = arith.constant 0 : i32
    %c0_i32_0 = arith.constant 0 : i32
    %c0_i32_1 = arith.constant 0 : i32
    return %arg0, %c0_i32, %c0_i32_0 : i32, i32, i32
  }
  func.func @transform_1(%arg0: i32) -> (i32, i32, i32) {
    %c0_i32 = arith.constant 0 : i32
    %c0_i32_0 = arith.constant 0 : i32
    %c0_i32_1 = arith.constant 0 : i32
    return %arg0, %c0_i32, %c0_i32_0 : i32, i32, i32
  }
  func.func @transform_2(%arg0: i32) -> (i32, i32) {
    %c0_i32 = arith.constant 0 : i32
    %c0_i32_0 = arith.constant 0 : i32
    %c0_i32_1 = arith.constant 0 : i32
    return %c0_i32, %c0_i32_0 : i32, i32
  }
  func.func @transform_3(%arg0: i32) -> (i32, i32) {
    %c0_i32 = arith.constant 0 : i32
    %c0_i32_0 = arith.constant 0 : i32
    %c0_i32_1 = arith.constant 0 : i32
    return %c0_i32, %c0_i32_0 : i32, i32
  }
  func.func @transform_4(%arg0: i32) -> (i32, i32, i32) {
    %c0_i32 = arith.constant 0 : i32
    %c0_i32_0 = arith.constant 0 : i32
    %c0_i32_1 = arith.constant 0 : i32
    return %arg0, %c0_i32, %c0_i32_0 : i32, i32, i32
  }
}

</mosaic_0001>

<bundles_post_ra>
// kernel: tpu_custom_call.1
= control target key start
LH: loop header
LB: loop body
LE: loop exit
PB: predicated region body
PF: predicated region fallthrough
CT: control target
= control target key end

     0   :  { %9 = vsyncpa [#allocation3], 0  ;;  %s878_s0 = inlined_call_operand.vmem [shape: s32[2,8,2], index: 0, kind: input, shape index: {}]   ;;  %s879_s1 = inlined_call_operand.hbm [shape: f32[2,24,128], index: 1, kind: input, shape index: {}]   ;;  %s880_s2 = inlined_call_operand.vmem [shape: f32[1,128], index: 2, kind: input, shape index: {}]   ;;  %s881_s3 = inlined_call_operand.vmem [shape: f32[1,128], index: 3, kind: input, shape index: {}]   ;;  %s882_s4 = inlined_call_operand.hbm [shape: f32[2,8,128], index: 4, kind: output, shape index: {}]  }
   0x1   :  { %11 = vsyncpa [#allocation3 + $0x1], 0 }
   0x2   :  { %12 = vsyncpa [#allocation4], 0 }
   0x3   :  { %14 = vsyncpa [#allocation4 + $0x1], 0  ;;  %s703_s15 = smov 0   ;;  %s705_s16 = smov 0  }
   0x4   :  { %s707_s17 = smov 0   ;;  %s709_s18 = smov 0  }
   0x5 LB: > { %s724_s19 = sadd.s32 4294967295, %s667_s18   ;;  %s480_s20 = sadd.s32 4294967294, %s667_s18   ;;  %s667_s18 = sphi %s709_s18, %s896_s18   ;;  %s663_s17 = sphi %s707_s17, %s895_s17   ;;  %s659_s16 = sphi %s705_s16, %s894_s16   ;;  %s655_s15 = sphi %s703_s15, %s893_s15  }
   0x6   : > { %s728_s21 = sadd.s32 1, %s667_s18   ;;  %s53_s22 = sadd.s32 1, %s663_s17 }
   0x7   : > { %s50_s23 = ssub.s32 %s667_s18, %s728_s21  ;;  %p60_p0 = scmp.ne.s32.totalorder %s663_s17, %s659_s16 }
   0x8   : > { %p51_p1 = scmp.eq.s32.totalorder %s50_s23, 0  ;;  %p61_p2 = scmp.eq.s32.totalorder %s667_s18, 0 }
   0x9   : > { %p66_p3 = scmp.ne.s32.totalorder %s659_s16, %s655_s15  ;;  %p67_p4 = scmp.eq.s32.totalorder %s724_s19, 0 }
   0xa   : > { %s740_s24 = scalar_select %p51_p1, %s663_s17, %s53_s22  }
   0xb   : > { %p62_p5 = por %p61_p2, %p60_p0  ;;  %p742_p6 = por %p67_p4, %p66_p3 }
   0xc   : > { %p132_p7 = scmp.eq.s32.totalorder %s724_s19, 1  ;;  %p138_p8 = scmp.eq.s32.totalorder %s480_s20, 1 }
   0xd   : > { %s885_s25 = scalar_select %p742_p6, 1, 0 }
   0xe   : > { %p522_p10 = scmp.lt.s32.totalorder %s667_s18, 2  ;;  %p749_p11 = por %p132_p7, %p60_p0 }
   0xf   : > { %p753_p12 = por %p138_p8, %p66_p3  ;;  %s171_s28 = sand.u32 1, %s663_s17  }
  0x10   : > { %s886_s26 = scalar_select %p749_p11, 1, 0 }
  0x11   : > { %s887_s27 = scalar_select %p753_p12, 1, 0 }
  0x12   : > { %s508_s29 = smul.u32 384, %s667_s18  ;;  %p764_p13 = pnand %p522_p10, %p62_p5 }
  0x13   : > { %s507_s30 = smul.u32 24, %s171_s28  ;;  %s770_s11 = scalar_lea.sflag [#allocation3], %s171_s28 }
  0x14   : > { %s762_s7 = scalar_lea.hbm %s879_s1, %s508_s29  ;;  %p577_p1 = pneg %p764_p13 }
  0x15   : > { %s175_s9 = scalar_lea.vmem [#allocation2], %s507_s30  ;;  %s575_s12 = scalar_lea.hbm %s762_s7, 384 }
  0x16   : > { %s182_s10 = sshll.u32 %s175_s9, 4  ;;  %p576_p0 = scmp.ne.s32.totalorder %s762_s7, %s575_s12  ;;  %s768_s10 = int_to_ptr.vmem [resolvable:$true] %s182_s10 }
  0x17   : > { %s580_s20 = scalar_lea.hbm %s879_s1, 768  ;;  %p581_p4 = scmp.lt.s32.totalorder %s762_s7, %s879_s1 }
  0x18   : > { %p578_p2 = pnand %p577_p1, %p576_p0  ;;  %p582_p5 = scmp.lt.s32.totalorder %s580_s20, %s575_s12 }
  0x1a   : > { %p579_p3 = pneg %p578_p2  ;;  %p583_p7 = por %p582_p5, %p581_p4 }
  0x1c   : > { %p584_p8 = pnand %p583_p7, %p579_p3 }
  0x1e   : > { %587 = shalt.err (!%p584_p8)
}
  0x1f   : > { %s588_s28 = scalar_lea.vmem %s768_s10, 384  ;;  %s669_s29 = smov [#allocation2]  }
  0x20   : > { %p589_p10 = scmp.ne.s32.totalorder %s768_s10, %s588_s28  ;;  %s593_s30 = sshll.u32 %s669_s29, 4  ;;  %s594_s30 = int_to_ptr.vmem [resolvable:$false] %s593_s30 }
  0x21   : > { %s595_s5 = scalar_lea.vmem %s594_s30, 768  ;;  %p596_p2 = scmp.lt.s32.totalorder %s768_s10, %s594_s30 }
  0x22   : > { %p591_p9 = pnand %p589_p10, %p577_p1  ;;  %p597_p12 = scmp.lt.s32.totalorder %s595_s5, %s588_s28 }
  0x24   : > { %p592_p0 = pneg %p591_p9  ;;  %p598_p11 = por %p597_p12, %p596_p2 }
  0x26   : > { %p599_p6 = pnand %p598_p11, %p592_p0 }
  0x28   : > { %602 = shalt.err (!%p599_p6)
}
  0x29   : > { %s670_s6 = smov 128   ;;  %s671_s9 = smov 8  }
  0x2a   : > { %517 = dma.hbm_to_vmem [thread:$0]  (!%p764_p13), %s762_s7, 384, %s768_s10, %s770_s11, %s670_s6, %s670_s6, %s671_s9  }
  0x2b   : > { %p484_p9 = scmp.ge.s32.totalorder %s667_s18, 1  ;;  %p190_p1 = scmp.lt.s32.totalorder %s667_s18, 3 }
  0x2d   : > { %p191_p3 = pnand %p484_p9, %p190_p1 }
  0x2e   : > { %s794_s12 = sand.u32 (!%p191_p3), 1, %s659_s16   ;;  %p889_p6 = scmp.ne.s32.totalorder (!%p191_p3), %s885_s25, 0 }
  0x2f   : > { %194 = sbr.rel (%p191_p3) target bundleno = 518 (0x206), region = 36  ;;  %s197_s14 = scalar_lea.sflag (!%p191_p3), [#allocation3], %s794_s12 }
  0x30   : > { %s509_s13 = smul.u32 (!%p191_p3), 24, %s794_s12 }
  0x32   : > { %s200_s20 = scalar_lea.vmem (!%p191_p3), [#allocation2], %s509_s13 }
  0x34   : > { %646 = dma.done.wait (%p889_p6), %s197_s14, 384  }
  0x35   : > { %648 = vsyncadd (%p889_p6), %s197_s14, 4294966912  ;;  %p229_p11 = scmp.lt.s32.totalorder %s724_s19, 1  ;;  %v672_v0 = vmov 0   ;;  %v807_v2 = vld [vmem:[%s200_s20] sm:$0xff]  ;;  %s673_s23 = smov 127   ;;  %v810_v3 = vld [vmem:[%s200_s20 + $0x8] sm:$0xff]  ;;  %v279_v53 = vlaneseq }
  0x36   : > { %564 = vset.pattern.permute.xlu0 %v672_v0  ;;  %563 = vset.pattern.permute.xlu1 %v672_v0  ;;  %v812_v4 = vld [vmem:[%s200_s20 + $0x10] sm:$0xff]  ;;  %v243_v6 = vmul.f32 %v807_v2, %v807_v2  ;;  %v244_v7 = vmul.f32 %v810_v3, %v810_v3  ;;  %v674_v8 = vmov 0.0   ;;  %vm675_vm1 = vmmov 0   ;;  %s485_s25 = sshll.u32 %s794_s12, 3  ;;  %v491_v60 = vld [vmem:[%s881_s3] ss:$0 sm:$0xff] }
  0x37   : > { %s230_s7 = scalar_select %p229_p11, %s724_s19, 1  ;;  %237 = vadd.xlane.f32.xlu1 %v807_v2  ;;  %v245_v5 = vmul.f32 %v812_v4, %v812_v4  ;;  %499 = vmatprep.subr.bf16.mxu0 %v674_v8  ;;  %v676_v13 = vmov 1   ;;  %vm303_vm3 = vcmask 1043456   ;;  %v280_v54 = vand.u32 127, %v279_v53  ;;  %v490_v63 = vld [vmem:[%s880_s2] ss:$0 sm:$0xff] }
  0x38   : > { %503 = vmatprep.mubr.msk.bf16.mxu0 %vm675_vm1, %v674_v8  ;;  %vm299_vm7 = vcmask 195584   ;;  %s493_s6 = sshll.u32 %s724_s19, 7  ;;  %s228_s9 = scalar_lea.vmem [#allocation5], %s485_s25 }
  0x39   : > { %s486_s8 = sshll.u32 %s230_s7, 3  ;;  %s398_s13 = sshll.u32 %s228_s9, 4  ;;  %s399_s13 = int_to_ptr.vmem [resolvable:$true] %s398_s13 }
  0x3a   : > { %s232_s22 = scalar_lea.vmem %s878_s0, %s486_s8  ;;  %s841_s7 = scalar_lea.hbm %s882_s4, %s493_s6 }
  0x3b   : > { %v281_v1 = vld [vmem:[%s232_s22] sm:$0xff]  ;;  %239 = vadd.xlane.f32.xlu1 %v810_v3  ;;  %s385_s8 = scalar_lea.sflag [#allocation4], %s794_s12  ;;  %s603_s10 = scalar_lea.vmem %s399_s13, 128 }
  0x3c   : > { %286 = vrot.lane.b32.xlu0 %v281_v1, %s673_s23  ;;  %vm350_vm0 = vcmp.gt.s32.totalorder %v281_v1, 1  ;;  %vm347_vm2 = vcmp.gt.s32.totalorder %v281_v1, 0  ;;  %p604_p12 = scmp.ne.s32.totalorder %s399_s13, %s603_s10  ;;  %p890_p13 = scmp.ne.s32.totalorder %s886_s26, 0 }
  0x3d   : > { %v351_v9 = vsel %vm350_vm0, %v281_v1, 1  ;;  %v489_v14 = vsel %vm347_vm2, 1.0, %v674_v8  ;;  %s677_s19 = smov [#allocation5]  }
  0x3e   : > { %v352_v10 = vcvt.s32.f32 %v351_v9  ;;  %p605_p4 = pnand %p604_p12, %p890_p13  ;;  %s607_s11 = sshll.u32 %s677_s19, 4  ;;  %s608_s11 = int_to_ptr.vmem [resolvable:$false] %s607_s11 }
  0x3f   : > { %250 = vadd.xlane.f32.xlu1 %v245_v5  ;;  %s609_s22 = scalar_lea.vmem %s608_s11, 256  ;;  %p610_p7 = scmp.lt.s32.totalorder %s399_s13, %s608_s11 }
  0x40   : > { %567 = vrcp.f32 %v352_v10  ;;  %p606_p5 = pneg %p605_p4  ;;  %p611_p8 = scmp.lt.s32.totalorder %s609_s22, %s603_s10 }
  0x42   : > { %p612_p10 = por %p611_p8, %p610_p7 }
  0x43   : > { %246 = vadd.xlane.f32.xlu1 %v243_v6 }
  0x44   : > { %p613_p0 = pnand %p612_p10, %p606_p5 }
  0x47   : > { %248 = vadd.xlane.f32.xlu1 %v244_v7 }
  0x4d   : > { %v568_v15 = vpop.eup %567 }
  0x4e   : > { %v354_v16 = vmul.f32 %v568_v15, %v489_v14 }
  0x58   : > { %283 = vperm.xlu1 %563, %v281_v1  }
  0x5b   : > { %241 = vadd.xlane.f32.xlu0 %v812_v4 }
  0x5c   : > { %565 = vset.pattern.permute.xlu1 %v676_v13 }
  0x5d   : > { %357 = vperm.xlu1 %565, %v354_v16  }
  0x61   : > { %378 = vperm.xlu1 %565, %v489_v14  }
  0xae   : > { %v287_v11 = vpop.permute.xlu0 %286 }
  0xaf   : > { %v288_v12 = vadd.s32 %v287_v11, %v281_v1 }
  0xb1   : > { %290 = vperm.xlu0 %564, %v288_v12  }
  0xb5   : > { %566 = vset.pattern.permute.xlu0 %v676_v13 }
  0xc0   : > { %v238_v17 = vpop.xlane.xlu1 %237 }
  0xc1   : > { %v252_v21 = vmul.f32 0.0078125, %v238_v17 }
  0xc3   : > { %v258_v24 = vmul.f32 %v252_v21, %v252_v21  ;;  %v273_v43 = vsub.f32 %v807_v2, %v252_v21 }
  0xc4   : > { %v240_v18 = vpop.xlane.xlu1 %239 }
  0xc5   : > { %v253_v22 = vmul.f32 0.0078125, %v240_v18 }
  0xc7   : > { %v259_v26 = vmul.f32 %v253_v22, %v253_v22  ;;  %v274_v44 = vsub.f32 %v810_v3, %v253_v22 }
  0xc8   : > { %v251_v19 = vpop.xlane.xlu1 %250 }
  0xc9   : > { %v257_v31 = vmul.f32 0.0078125, %v251_v19 }
  0xcc   : > { %v247_v20 = vpop.xlane.xlu1 %246 }
  0xcd   : > { %v255_v25 = vmul.f32 0.0078125, %v247_v20 }
  0xcf   : > { %v261_v28 = vsub.f32 %v255_v25, %v258_v24 }
  0xd0   : > { %v249_v23 = vpop.xlane.xlu1 %248 }
  0xd1   : > { %v256_v27 = vmul.f32 0.0078125, %v249_v23  ;;  %v264_v33 = vmax.f32 %v261_v28, 0.0 }
  0xd3   : > { %v262_v29 = vsub.f32 %v256_v27, %v259_v26  ;;  %v267_v37 = vadd.f32 1e-12, %v264_v33 }
  0xd4   : > { %v284_v55 = vpop.permute.xlu1 %283 }
  0xd5   : > { %v265_v34 = vmax.f32 %v262_v29, 0.0  ;;  %569 = vrsqrt.f32 %v267_v37  ;;  %vm285_vm4 = vcmp.ge.s32.totalorder %v280_v54, %v284_v55 }
  0xd7   : > { %v268_v38 = vadd.f32 1e-12, %v265_v34 }
  0xd8   : > { %v358_v59 = vpop.permute.xlu1 %357 }
  0xd9   : > { %571 = vrsqrt.f32 %v268_v38 }
  0xdc   : > { %v379_v61 = vpop.permute.xlu1 %378 }
  0xdd   : > { %v381_v2 = vmul.f32 %v491_v60, %v379_v61 }
  0xe2   : > { %v570_v42 = vpop.eup %569 }
  0xe3   : > { %v276_v48 = vmul.f32 %v570_v42, %v273_v43 }
  0xe4   : > { %v242_v30 = vpop.xlane.xlu0 %241 }
  0xe5   : > { %v254_v32 = vmul.f32 0.0078125, %v242_v30 }
  0xe6   : > { %v572_v45 = vpop.eup %571 }
  0xe7   : > { %v260_v35 = vmul.f32 %v254_v32, %v254_v32  ;;  %v275_v41 = vsub.f32 %v812_v4, %v254_v32  ;;  %v277_v49 = vmul.f32 %v572_v45, %v274_v44 }
  0xe9   : > { %v263_v36 = vsub.f32 %v257_v31, %v260_v35  ;;  %v297_v52 = vpack.c.bf16 %v277_v49, %v276_v48 }
  0xeb   : > { %v266_v39 = vmax.f32 %v263_v36, 0.0 }
  0xed   : > { %v269_v40 = vadd.f32 1e-12, %v266_v39 }
  0xef   : > { %573 = vrsqrt.f32 %v269_v40 }
  0xfc   : > { %v574_v46 = vpop.eup %573 }
  0xfd   : > { %v278_v47 = vmul.f32 %v574_v46, %v275_v41 }
  0xff   : > { %v298_v50 = vpack.c.bf16 %v278_v47, %v278_v47 }
 0x101   : > { %v305_v51 = vsel %vm303_vm3, %v298_v50, 0 }
 0x102   : > { %500 = vmatpush3.bf16.msra.mxu0 %v305_v51 }
 0x103   : > { %501 = vmatprep.subr.bf16.mxu0 %v674_v8 }
 0x106   : > { %502 = vmatpush3.bf16.msra.mxu0 %v297_v52 }
 0x12c   : > { %v291_v56 = vpop.permute.xlu0 %290 }
 0x12d   : > { %vm292_vm5 = vcmp.lt.s32.totalorder %v280_v54, %v291_v56 }
 0x12e   : > { %vm293_vm6 = vmand %vm285_vm4, %vm292_vm5 }
 0x12f   : > { %v487_v57 = vsel %vm293_vm6, 1.0, %v674_v8 }
 0x130   : > { %v296_v58 = vpack.c.bf16 %v487_v57, %v487_v57 }
 0x132   : > { %504 = vmatmul.mubr.msk.bf16.vlgmr.msra.gmra.mxu0 %vm299_vm7, %v296_v58 }
 0x1f2   : > { %v341_v62 = vpop.f32.mrf.mxu0 }
 0x1f3   : > { %v360_v0 = vmul.f32 %v358_v59, %v341_v62 }
 0x1f4   : > { %v505_v1 = vpop.f32.mrf.mxu0 }
 0x1f5   : > { %v368_v3 = vmul.f32 %v490_v63, %v360_v0 }
 0x1f6   : > { %v344_v4 = vpop.f32.mrf.mxu0 }
 0x1f7   : > { %v382_v5 = vadd.f32 %v381_v2, %v368_v3 }
 0x1f8   : > { %v506_v6 = vpop.f32.mrf.mxu0 }
 0x1f9   : > { %383 = vst [vmem:[%s228_s9] sm:$0xff] %v382_v5 }
 0x1fa   : > { %616 = shalt.err (!%p613_p0)
}
 0x1fb   : > { %s617_s23 = scalar_lea.hbm %s841_s7, 128  ;;  %s621_s28 = scalar_lea.hbm %s882_s4, 256 }
 0x1fc   : > { %p618_p2 = scmp.ne.s32.totalorder %s841_s7, %s617_s23  ;;  %p622_p3 = scmp.lt.s32.totalorder %s841_s7, %s882_s4 }
 0x1fd   : > { %p623_p6 = scmp.lt.s32.totalorder %s621_s28, %s617_s23 }
 0x1fe   : > { %p619_p9 = pnand %p618_p2, %p890_p13 }
 0x1ff   : > { %p624_p11 = por %p623_p6, %p622_p3 }
 0x200   : > { %p620_p1 = pneg %p619_p9 }
 0x202   : > { %p625_p12 = pnand %p624_p11, %p620_p1 }
 0x204   : > { %628 = shalt.err (!%p625_p12)
}
 0x205   : > { %512 = dma.vmem_to_hbm [thread:$0]  (%p890_p13), %s399_s13, 128, %s841_s7, %s385_s8  }
 0x206 PF: > { %s410_s5 = sand.u32 1, %s655_s15   ;;  %p891_p4 = scmp.ne.s32.totalorder %s887_s27, 0 }
 0x207   : > { %p892_p5 = scmp.ge.s32.totalorder %s667_s18, 2  ;;  %s411_s6 = scalar_lea.sflag [#allocation4], %s410_s5 }
 0x209   : > { %p519_p7 = pnand %p892_p5, %p891_p4 }
 0x20b   : > { %p520_p8 = pneg %p519_p7 }
 0x20d   : > { %650 = dma.done.wait (%p520_p8), %s411_s6, 128  }
 0x20e   : > { %652 = vsyncadd (%p520_p8), %s411_s6, 4294967168  ;;  %p17_p10 = scmp.ge.s32.totalorder %s728_s21, 4   ;;  %s893_s15 = smov %s659_s16 }
 0x20f   : > { %s894_s16 = smov %s663_s17  ;;  %s895_s17 = smov %s740_s24 }
 0x210   : > { %s896_s18 = smov %s728_s21  ;;  %19 = sbr.rel (!%p17_p10) target bundleno = 5 (0x5), region = 84 }
 0x215   :  { %416 = vsyncpa [#allocation3], 1 }
 0x216   :  { %418 = vsyncpa [#allocation3 + $0x1], 1 }
 0x217   :  { %419 = vsyncpa [#allocation4], 1 }
 0x218   :  { %421 = vsyncpa [#allocation4 + $0x1], 1 }

</bundles_post_ra>
